<compile_context>
chip_gen: v5e
topology: v5e:2x2
jax: 0.10.0
libtpu: 0.0.40
codegen_flags: <defaults>
</compile_context>

<pallas_src>
import math

import jax
import jax.numpy as jnp
from jax.experimental import pallas as pl
from jax.experimental.pallas import tpu as pltpu


def _transpose_kernel(x_ref, o_ref):
    # x_ref block: (1, tr, tc) ; o_ref block: (1, tc, tr).
    # Plain 2-D transpose of the tile; the XLU handles the in-tile relayout.
    o_ref[0] = x_ref[0].T


def _as_batched_transpose(shape, perm):
    """If perm == identity prefix + [split..ndim) + [p..split), return
    (batch, rows, cols) such that the permute is a batched 2-D transpose of
    x.reshape(batch, rows, cols).  Otherwise return None."""
    ndim = len(shape)
    p = 0
    while p < ndim and perm[p] == p:
        p += 1
    if p == ndim:
        return None  # identity (handled by caller)
    rest = perm[p:]
    split = rest[0]
    if split <= p or split >= ndim:
        return None
    expected = tuple(range(split, ndim)) + tuple(range(p, split))
    if tuple(rest) != expected:
        return None
    batch = math.prod(shape[:p])
    rows = math.prod(shape[p:split])
    cols = math.prod(shape[split:])
    return batch, rows, cols


def _pick_tile(dim, target):
    """Full dim if it already fits the target; otherwise the largest multiple of
    128 that divides it (keeps every tiled axis lane-dense / 8-aligned)."""
    if dim <= target:
        return dim
    t = (target // 128) * 128
    while t >= 128:
        if dim % t == 0:
            return t
        t -= 128
    # No 128-aligned divisor: fall back to the full dim (always legal).
    return dim


def permute_pallas(x, perm, *, row_tile=512, col_tile=512):
    """Pallas equivalent of torch `x.permute(*perm)`."""
    ndim = x.ndim
    perm = tuple(int(p) % ndim for p in perm)
    assert sorted(perm) == list(range(ndim)), f"invalid permutation {perm}"

    if perm == tuple(range(ndim)):
        return x  # identity permute

    dec = _as_batched_transpose(x.shape, perm)
    if dec is None:
        # TODO(synk): permutations that are not (identity prefix + swap of two
        # contiguous axis groups), e.g. (0, 2, 1, 3), have no single clean
        # rectangular-tile Pallas formulation; fall back to XLA's transpose.
        return jnp.transpose(x, perm)

    batch, rows, cols = dec
    out_shape_nd = tuple(x.shape[p] for p in perm)

    x3 = x.reshape(batch, rows, cols)
    tr = _pick_tile(rows, row_tile)
    tc = _pick_tile(cols, col_tile)
    grid = (batch, rows // tr, cols // tc)

    out3 = pl.pallas_call(
        _transpose_kernel,
        out_shape=jax.ShapeDtypeStruct((batch, cols, rows), x.dtype),
        grid_spec=pltpu.PrefetchScalarGridSpec(
            num_scalar_prefetch=0,
            grid=grid,
            in_specs=[pl.BlockSpec((1, tr, tc), lambda b, i, j: (b, i, j))],
            out_specs=pl.BlockSpec((1, tc, tr), lambda b, i, j: (b, j, i)),
        ),
        compiler_params=pltpu.CompilerParams(
            dimension_semantics=("parallel", "parallel", "parallel")),
        cost_estimate=pl.CostEstimate(
            flops=0,
            transcendentals=0,
            bytes_accessed=2 * x.size * x.dtype.itemsize),
    )(x3)

    # Row-major contiguous regrouping back to the permuted N-D shape (free).
    return out3.reshape(out_shape_nd)


if __name__ == "__main__":
    key = jax.random.PRNGKey(0)
    B, C, H, W = 2, 32, 16, 16
    x = jax.random.normal(key, (B, C, H, W), dtype=jnp.float32)

    # VMamba's two Permute instances: NCHW -> NHWC and back.
    perm1 = (0, 2, 3, 1)
    y = permute_pallas(x, perm1)
    y = jax.block_until_ready(y)
    ref1 = jnp.transpose(x, perm1)
    assert y.shape == ref1.shape
    assert jnp.array_equal(y, ref1), "mismatch for perm (0, 2, 3, 1)"

    perm2 = (0, 3, 1, 2)
    z = permute_pallas(y, perm2)
    z = jax.block_until_ready(z)
    ref2 = jnp.transpose(y, perm2)
    assert jnp.array_equal(z, ref2), "mismatch for perm (0, 3, 1, 2)"
    assert jnp.array_equal(z, x), "round-trip permute mismatch"

    print("KERNEL_OK")
</pallas_src>

<mosaic_0001>
module attributes {stable_mosaic.version = 11 : i64} {
  func.func @_transpose_kernel(%arg0: i32, %arg1: i32, %arg2: i32, %arg3: memref<1x32x256xf32, #tpu.memory_space<vmem>>, %arg4: memref<1x256x32xf32, #tpu.memory_space<vmem>>) attributes {dimension_semantics = [#tpu.dimension_semantics<parallel>, #tpu.dimension_semantics<parallel>, #tpu.dimension_semantics<parallel>], iteration_bounds = array<i64: 2, 1, 1>, scalar_prefetch = 0 : i64, scratch_operands = 0 : i64, tpu.core_type = #tpu.core_type<tc>, window_params = [{transform_indices = @transform_0, window_bounds = array<i64: 1, 32, 256>}, {transform_indices = @transform_1, window_bounds = array<i64: 1, 256, 32>}]} {
    %c0 = arith.constant 0 : index
    %c0_0 = arith.constant 0 : index
    %c0_1 = arith.constant 0 : index
    %0 = vector.load %arg3[%c0, %c0_0, %c0_1] : memref<1x32x256xf32, #tpu.memory_space<vmem>>, vector<1x32x256xf32>
    %1 = vector.shape_cast %0 : vector<1x32x256xf32> to vector<32x256xf32>
    %2 = tpu.transpose %1, [1, 0] : vector<32x256xf32> -> vector<256x32xf32>
    %c0_2 = arith.constant 0 : index
    %c0_3 = arith.constant 0 : index
    %c0_4 = arith.constant 0 : index
    %3 = vector.load %arg4[%c0_2, %c0_3, %c0_4] : memref<1x256x32xf32, #tpu.memory_space<vmem>>, vector<1x256x32xf32>
    %4 = vector.shape_cast %3 : vector<1x256x32xf32> to vector<256x32xf32>
    %5 = vector.shape_cast %2 : vector<256x32xf32> to vector<1x256x32xf32>
    tpu.vector_store %arg4[%c0_2, %c0_3, %c0_4], %5 {strides = array<i32>} : memref<1x256x32xf32, #tpu.memory_space<vmem>>, vector<1x256x32xf32>,
    return
  }
  func.func @transform_0(%arg0: i32, %arg1: i32, %arg2: i32) -> (i32, i32, i32) {
    %c0_i32 = arith.constant 0 : i32
    return %arg0, %arg1, %arg2 : i32, i32, i32
  }
  func.func @transform_1(%arg0: i32, %arg1: i32, %arg2: i32) -> (i32, i32, i32) {
    %c0_i32 = arith.constant 0 : i32
    return %arg0, %arg2, %arg1 : i32, i32, i32
  }
}

</mosaic_0001>

<bundles_post_ra>
// kernel: tpu_custom_call.1
= control target key start
LH: loop header
LB: loop body
LE: loop exit
PB: predicated region body
PF: predicated region fallthrough
CT: control target
= control target key end

     0   :  { %6 = vsyncpa [#allocation3], 0  ;;  %s724_s0 = inlined_call_operand.hbm [shape: f32[2,32,256], index: 0, kind: input, shape index: {}]   ;;  %s725_s1 = inlined_call_operand.vmem [shape: f32[2,256,32], index: 1, kind: output, shape index: {}]  }
   0x1   :  { %8 = vsyncpa [#allocation3 + $0x1], 0  ;;  %s570_s6 = smov 0   ;;  %s572_s7 = smov 0  }
   0x2   :  { %s574_s8 = smov 0   ;;  %s576_s9 = smov 0  }
   0x3   :  { %s578_s10 = smov 0   ;;  %s580_s11 = smov 0  }
   0x4 LB: > { %s403_s12 = sadd.s32 4294967295, %s556_s11   ;;  %s33_s13 = sadd.s32 1, %s552_s10  ;;  %s556_s11 = sphi %s580_s11, %s14_s11   ;;  %s552_s10 = sphi %s578_s10, %s732_s10   ;;  %s548_s9 = sphi %s576_s9, %s731_s9   ;;  %s544_s8 = sphi %s574_s8, %s730_s8   ;;  %s540_s7 = sphi %s572_s7, %s729_s7   ;;  %s536_s6 = sphi %s570_s6, %s728_s6  }
   0x5   : > { %p35_p0 = scmp.ge.s32.totalorder %s33_s13, 2  ;;  %s44_s14 = sadd.s32 1, %s544_s8 }
   0x6   : > { %p51_p1 = scmp.ne.s32.totalorder %s544_s8, %s540_s7  ;;  %p52_p2 = scmp.eq.s32.totalorder %s556_s11, 0 }
   0x7   : > { %s734_s13 = smov (%p35_p0, %s33_s13), 0  ;;  %p57_p4 = scmp.ne.s32.totalorder %s540_s7, %s536_s6 }
   0x8   : > { %p606_p3 = por %p52_p2, %p51_p1  ;;  %s37_s16 = ssub.s32 %s552_s10, %s734_s13 }
   0x9   : > { %p58_p5 = scmp.eq.s32.totalorder %s403_s12, 0  ;;  %p42_p6 = scmp.eq.s32.totalorder %s37_s16, 0 }
   0xa   : > { %p424_p8 = scmp.lt.s32.totalorder %s556_s11, 2  ;;  %s111_s19 = sand.u32 1, %s544_s8  }
   0xb   : > { %p613_p7 = por %p58_p5, %p57_p4  ;;  %s416_s20 = sshll.u32 %s552_s10, 6 }
   0xc   : > { %s619_s18 = scalar_select %p42_p6, %s544_s8, %s44_s14  }
   0xd   : > { %s407_s21 = sshll.u32 %s111_s19, 6  ;;  %s125_s24 = scalar_lea.hbm %s724_s0, %s416_s20 }
   0xe   : > { %s126_s25 = sshll.u32 %s125_s24, 4  ;;  %s115_s26 = scalar_lea.vmem [#allocation2], %s407_s21  ;;  %s127_s25 = int_to_ptr.hbm [resolvable:$true] %s126_s25 }
   0xf   : > { %s128_s27 = sshll.u32 %s115_s26, 4  ;;  %p421_p9 = pnand %p424_p8, %p606_p3  ;;  %s129_s27 = int_to_ptr.vmem [resolvable:$true] %s128_s27 }
  0x10   : > { %p410_p10 = scmp.ge.s32.totalorder %s556_s11, 1  ;;  %p136_p11 = scmp.lt.s32.totalorder %s556_s11, 3 }
  0x11   : > { %s112_s28 = scalar_lea.sflag [#allocation3], %s111_s19  ;;  %s558_s29 = smov 256  }
  0x12   : > { %s559_s30 = smov 16   ;;  %p137_p12 = pnand %p410_p10, %p136_p11 }
  0x13   : > { %423 = dma.hbm_to_vmem [thread:$0]  (!%p421_p9), %s127_s25, 1024, %s129_s27, %s112_s28, %s558_s29, %s558_s29, %s559_s30  }
  0x14   : > { %140 = sbr.rel (%p137_p12) target bundleno = 314 (0x13a), region = 24  ;;  %s142_s2 = sand.u32 (!%p137_p12), 1, %s540_s7  }
  0x15   : > { %s411_s3 = sshll.u32 (!%p137_p12), %s142_s2, 6  ;;  %s143_s4 = scalar_lea.sflag (!%p137_p12), [#allocation3], %s142_s2 }
  0x16   : > { %s146_s5 = scalar_lea.vmem (!%p137_p12), [#allocation2], %s411_s3 }
  0x19   : > { %531 = dma.done.wait (%p613_p7), %s143_s4, 1024  }
  0x1a   : > { %533 = vsyncadd (%p613_p7), %s143_s4, 4294966272  ;;  %v189_v0 = vld [vmem:[%s146_s5 + $0x8] sm:$0xff]  ;;  %v188_v1 = vld [vmem:[%s146_s5] sm:$0xff]  ;;  %p176_p13 = scmp.lt.s32.totalorder %s548_s9, 1  ;;  %vm260_vm0 = vcmask 261120  }
  0x1b   : > { %228 = vxpose.xlu1.b32.start [1/4] (short) %v189_v0, 128  ;;  %196 = vxpose.xlu0.b32.start [1/4] (short) %v188_v1, 128  ;;  %v191_v2 = vld [vmem:[%s146_s5 + $0x18] sm:$0xff]  ;;  %v190_v3 = vld [vmem:[%s146_s5 + $0x10] sm:$0xff]  ;;  %v193_v4 = vld [vmem:[%s146_s5 + $0x28] sm:$0xff] }
  0x1c   : > { %v192_v5 = vld [vmem:[%s146_s5 + $0x20] sm:$0xff]  ;;  %v195_v6 = vld [vmem:[%s146_s5 + $0x38] sm:$0xff]  ;;  %v194_v7 = vld [vmem:[%s146_s5 + $0x30] sm:$0xff]  ;;  %s736_s9 = smov (!%p176_p13, %s548_s9), 1 }
  0x1d   : > { %s417_s6 = sshll.u32 %s736_s9, 8 }
  0x1e   : > { %s640_s15 = scalar_lea.vmem %s725_s1, %s417_s6 }
  0x23   : > { %229 = vxpose.xlu1.b32.cont [2/4] (short) %v191_v2, 128  ;;  %197 = vxpose.xlu0.b32.cont [2/4] (short) %v190_v3, 128 }
  0x2b   : > { %230 = vxpose.xlu1.b32.cont [3/4] (short) %v193_v4, 128  ;;  %198 = vxpose.xlu0.b32.cont [3/4] (short) %v192_v5, 128 }
  0x33   : > { %231 = vxpose.xlu1.b32.end [4/4] (short) %v195_v6, 128  ;;  %199 = vxpose.xlu0.b32.end [4/4] (short) %v194_v7, 128 }
  0xbf   : > { %v244_v8 = vpop.trf.xlu1  ;;  %v212_v9 = vpop.trf.xlu0 }
  0xc0   : > { %277 = vst.msk [vmem:[%s640_s15 + $0x80] sm:$0xff] %vm260_vm0, %v244_v8 }
  0xc1   : > { %261 = vst.msk [vmem:[%s640_s15] sm:$0xff] %vm260_vm0, %v212_v9 }
  0xc7   : > { %v245_v10 = vpop.trf.xlu1  ;;  %v213_v11 = vpop.trf.xlu0 }
  0xc8   : > { %278 = vst.msk [vmem:[%s640_s15 + $0x88] sm:$0xff] %vm260_vm0, %v245_v10 }
  0xc9   : > { %262 = vst.msk [vmem:[%s640_s15 + $0x8] sm:$0xff] %vm260_vm0, %v213_v11 }
  0xcf   : > { %v246_v12 = vpop.trf.xlu1  ;;  %v214_v13 = vpop.trf.xlu0 }
  0xd0   : > { %279 = vst.msk [vmem:[%s640_s15 + $0x90] sm:$0xff] %vm260_vm0, %v246_v12 }
  0xd1   : > { %263 = vst.msk [vmem:[%s640_s15 + $0x10] sm:$0xff] %vm260_vm0, %v214_v13 }
  0xd7   : > { %v247_v14 = vpop.trf.xlu1  ;;  %v215_v15 = vpop.trf.xlu0 }
  0xd8   : > { %280 = vst.msk [vmem:[%s640_s15 + $0x98] sm:$0xff] %vm260_vm0, %v247_v14 }
  0xd9   : > { %264 = vst.msk [vmem:[%s640_s15 + $0x18] sm:$0xff] %vm260_vm0, %v215_v15 }
  0xdf   : > { %v248_v16 = vpop.trf.xlu1  ;;  %v216_v17 = vpop.trf.xlu0 }
  0xe0   : > { %281 = vst.msk [vmem:[%s640_s15 + $0xa0] sm:$0xff] %vm260_vm0, %v248_v16 }
  0xe1   : > { %265 = vst.msk [vmem:[%s640_s15 + $0x20] sm:$0xff] %vm260_vm0, %v216_v17 }
  0xe7   : > { %v249_v18 = vpop.trf.xlu1  ;;  %v217_v19 = vpop.trf.xlu0 }
  0xe8   : > { %282 = vst.msk [vmem:[%s640_s15 + $0xa8] sm:$0xff] %vm260_vm0, %v249_v18 }
  0xe9   : > { %266 = vst.msk [vmem:[%s640_s15 + $0x28] sm:$0xff] %vm260_vm0, %v217_v19 }
  0xef   : > { %v250_v20 = vpop.trf.xlu1  ;;  %v218_v21 = vpop.trf.xlu0 }
  0xf0   : > { %283 = vst.msk [vmem:[%s640_s15 + $0xb0] sm:$0xff] %vm260_vm0, %v250_v20 }
  0xf1   : > { %267 = vst.msk [vmem:[%s640_s15 + $0x30] sm:$0xff] %vm260_vm0, %v218_v21 }
  0xf7   : > { %v251_v22 = vpop.trf.xlu1  ;;  %v219_v23 = vpop.trf.xlu0 }
  0xf8   : > { %284 = vst.msk [vmem:[%s640_s15 + $0xb8] sm:$0xff] %vm260_vm0, %v251_v22 }
  0xf9   : > { %268 = vst.msk [vmem:[%s640_s15 + $0x38] sm:$0xff] %vm260_vm0, %v219_v23 }
  0xff   : > { %v252_v24 = vpop.trf.xlu1  ;;  %v220_v25 = vpop.trf.xlu0 }
 0x100   : > { %285 = vst.msk [vmem:[%s640_s15 + $0xc0] sm:$0xff] %vm260_vm0, %v252_v24 }
 0x101   : > { %269 = vst.msk [vmem:[%s640_s15 + $0x40] sm:$0xff] %vm260_vm0, %v220_v25 }
 0x107   : > { %v253_v26 = vpop.trf.xlu1  ;;  %v221_v27 = vpop.trf.xlu0 }
 0x108   : > { %286 = vst.msk [vmem:[%s640_s15 + $0xc8] sm:$0xff] %vm260_vm0, %v253_v26 }
 0x109   : > { %270 = vst.msk [vmem:[%s640_s15 + $0x48] sm:$0xff] %vm260_vm0, %v221_v27 }
 0x10f   : > { %v254_v28 = vpop.trf.xlu1  ;;  %v222_v29 = vpop.trf.xlu0 }
 0x110   : > { %287 = vst.msk [vmem:[%s640_s15 + $0xd0] sm:$0xff] %vm260_vm0, %v254_v28 }
 0x111   : > { %271 = vst.msk [vmem:[%s640_s15 + $0x50] sm:$0xff] %vm260_vm0, %v222_v29 }
 0x117   : > { %v255_v30 = vpop.trf.xlu1  ;;  %v223_v31 = vpop.trf.xlu0 }
 0x118   : > { %288 = vst.msk [vmem:[%s640_s15 + $0xd8] sm:$0xff] %vm260_vm0, %v255_v30 }
 0x119   : > { %272 = vst.msk [vmem:[%s640_s15 + $0x58] sm:$0xff] %vm260_vm0, %v223_v31 }
 0x11f   : > { %v256_v32 = vpop.trf.xlu1  ;;  %v224_v33 = vpop.trf.xlu0 }
 0x120   : > { %289 = vst.msk [vmem:[%s640_s15 + $0xe0] sm:$0xff] %vm260_vm0, %v256_v32 }
 0x121   : > { %273 = vst.msk [vmem:[%s640_s15 + $0x60] sm:$0xff] %vm260_vm0, %v224_v33 }
 0x127   : > { %v257_v34 = vpop.trf.xlu1  ;;  %v225_v35 = vpop.trf.xlu0 }
 0x128   : > { %290 = vst.msk [vmem:[%s640_s15 + $0xe8] sm:$0xff] %vm260_vm0, %v257_v34 }
 0x129   : > { %274 = vst.msk [vmem:[%s640_s15 + $0x68] sm:$0xff] %vm260_vm0, %v225_v35 }
 0x12f   : > { %v258_v36 = vpop.trf.xlu1  ;;  %v226_v37 = vpop.trf.xlu0 }
 0x130   : > { %291 = vst.msk [vmem:[%s640_s15 + $0xf0] sm:$0xff] %vm260_vm0, %v258_v36 }
 0x131   : > { %275 = vst.msk [vmem:[%s640_s15 + $0x70] sm:$0xff] %vm260_vm0, %v226_v37 }
 0x137   : > { %v259_v38 = vpop.trf.xlu1  ;;  %v227_v39 = vpop.trf.xlu0 }
 0x138   : > { %292 = vst.msk [vmem:[%s640_s15 + $0xf8] sm:$0xff] %vm260_vm0, %v259_v38 }
 0x139   : > { %276 = vst.msk [vmem:[%s640_s15 + $0x78] sm:$0xff] %vm260_vm0, %v227_v39 }
 0x13a PF: > { %s14_s11 = sadd.s32 1, %s556_s11   ;;  %s728_s6 = smov %s540_s7 }
 0x13b   : > { %p11_p0 = scmp.ge.s32.totalorder %s14_s11, 4   ;;  %s729_s7 = smov %s544_s8 }
 0x13c   : > { %s730_s8 = smov %s619_s18  ;;  %s731_s9 = smov %s552_s10 }
 0x13d   : > { %s732_s10 = smov %s734_s13  ;;  %13 = sbr.rel (!%p11_p0) target bundleno = 4 (0x4), region = 64 }
 0x142   :  { %329 = vsyncpa [#allocation3], 1 }
 0x143   :  { %331 = vsyncpa [#allocation3 + $0x1], 1 }

</bundles_post_ra>
